<compile_context>
chip_gen: v7x
topology: tpu7x:2x2x1
jax: 0.10.0
libtpu: 0.0.40
codegen_flags: <defaults>
</compile_context>

<pallas_src>
import functools

import jax
import jax.numpy as jnp
from jax import lax
from jax.experimental import pallas as pl
from jax.experimental.pallas import tpu as pltpu


def block_kernel(xq_ref, xkv_ref, wq_ref, wkv_ref, wff_ref, bff_ref, o_ref,
                 *, num_heads, head_size, q_block):
    """One grid step = one (batch, query-tile) pair.

    xq_ref  : (1, TQ, C)   query tile of the input
    xkv_ref : (1, T,  C)   full sequence for this batch element (K/V source)
    wq_ref  : (C, C)       fused per-head Q weights (1/sqrt(H) pre-folded)
    wkv_ref : (C, 2C)      fused per-head K|V weights
    wff_ref : (NH, H, C)   feed-forward weight, split per head ((in, out) layout)
    bff_ref : (1, C)       feed-forward bias
    o_ref   : (1, TQ, C)   output tile
    """
    NH, H, TQ = num_heads, head_size, q_block
    T = xkv_ref.shape[1]
    C = xkv_ref.shape[2]
    cdt = xq_ref.dtype                      # compute dtype (f32, or bf16 on v6e/v7x)

    qi = pl.program_id(1)
    q_start = qi * TQ                       # first query row of this tile

    x_q = xq_ref[0]                         # (TQ, C)
    x_kv = xkv_ref[0]                       # (T, C)

    # ---- fused projections: two wide, lane-dense MXU matmuls ----------------
    q_full = jnp.dot(x_q, wq_ref[...],
                     preferred_element_type=jnp.float32).astype(cdt)     # (TQ, C)
    kv_full = jnp.dot(x_kv, wkv_ref[...],
                      preferred_element_type=jnp.float32).astype(cdt)    # (T, 2C)

    # Head-major stacks built from static lane slices (major-axis concat only,
    # no minor-dim reshapes, no per-head matmuls).
    q3 = jnp.stack([q_full[:, h * H:(h + 1) * H] for h in range(NH)], axis=0)           # (NH, TQ, H)
    k3 = jnp.stack([kv_full[:, h * H:(h + 1) * H] for h in range(NH)], axis=0)          # (NH, T, H)
    v3 = jnp.stack([kv_full[:, C + h * H:C + (h + 1) * H] for h in range(NH)], axis=0)  # (NH, T, H)

    # ---- additive causal mask, built once per grid step ----------------------
    rows = q_start + lax.broadcasted_iota(jnp.int32, (TQ, T), 0)
    cols = lax.broadcasted_iota(jnp.int32, (TQ, T), 1)
    mask_bias = jnp.where(cols <= rows, 0.0, -1e9).astype(jnp.float32)   # (TQ, T)

    # ---- batched attention over all heads at once -----------------------------
    scores = jnp.einsum('hqd,hkd->hqk', q3, k3,
                        preferred_element_type=jnp.float32)              # (NH, TQ, T)
    scores = scores + mask_bias[None, :, :]

    m = jnp.max(scores, axis=-1, keepdims=True)
    e = jnp.exp(scores - m)
    denom = jnp.sum(e, axis=-1, keepdims=True)
    p = (e * pl.reciprocal(denom, approx=True)).astype(cdt)              # (NH, TQ, T)

    o3 = jnp.einsum('hqk,hkd->hqd', p, v3,
                    preferred_element_type=jnp.float32).astype(cdt)      # (NH, TQ, H)

    # ---- fused head-concat + FeedForward --------------------------------------
    # cat_h(O_h) @ Wff^T  ==  sum_h O_h @ Wff^T[h*H:(h+1)*H, :]
    y = jnp.einsum('hqd,hdc->hqc', o3, wff_ref[...],
                   preferred_element_type=jnp.float32)                   # (NH, TQ, C)
    y = jnp.sum(y, axis=0) + bff_ref[...]                                # (TQ, C)
    o_ref[0] = jnp.maximum(y, 0.0).astype(o_ref.dtype)


def block_forward(x, wq, wk, wv, wff, bff, *, num_heads, q_block=None,
                  compute_dtype=jnp.float32):
    """x: (B, T, C) f32.  wq/wk/wv: (NH, H, C) torch Linear layout (out, in).
    wff: (C, C) torch layout (out, in).  bff: (C,).

    compute_dtype: jnp.bfloat16 on v6e/v7x for 2x MXU rate / half the
    weight+activation traffic (accumulation stays f32)."""
    B, T, C = x.shape
    H = C // num_heads
    assert H * num_heads == C

    # Query-tile size: multiple of 8 (f32 sublane) dividing T, or the full T.
    if q_block is None:
        q_block = T
        for cand in (512, 256, 128, 64, 32, 16, 8):
            if T % cand == 0:
                q_block = cand
                break
    assert T % q_block == 0 and (q_block % 8 == 0 or q_block == T)

    scale = H ** (-0.5)
    # (NH, H, C) -> (C, NH*H): column block h holds head h's weights, so the
    # fused matmul output matches torch.cat([head_h(x)], dim=-1) ordering.
    wq_f = jnp.transpose(wq, (2, 0, 1)).reshape(C, C) * scale    # scale folded into Q
    wk_f = jnp.transpose(wk, (2, 0, 1)).reshape(C, C)
    wv_f = jnp.transpose(wv, (2, 0, 1)).reshape(C, C)
    wkv_f = jnp.concatenate([wk_f, wv_f], axis=1)                # (C, 2C)
    wff3 = wff.T.reshape(num_heads, H, C)                        # per-head (in, out) slices
    bff_2d = bff.reshape(1, C).astype(jnp.float32)

    xc = x.astype(compute_dtype)
    wq_f = wq_f.astype(compute_dtype)
    wkv_f = wkv_f.astype(compute_dtype)
    wff3 = wff3.astype(compute_dtype)

    kernel = functools.partial(block_kernel, num_heads=num_heads,
                               head_size=H, q_block=q_block)
    grid = (B, T // q_block)

    return pl.pallas_call(
        kernel,
        out_shape=jax.ShapeDtypeStruct((B, T, C), x.dtype),
        grid_spec=pltpu.PrefetchScalarGridSpec(
            num_scalar_prefetch=0,
            grid=grid,
            in_specs=[
                pl.BlockSpec((1, q_block, C), lambda b, q: (b, q, 0)),    # x (query tile)
                pl.BlockSpec((1, T, C), lambda b, q: (b, 0, 0)),          # x (K/V source)
                pl.BlockSpec((C, C), lambda b, q: (0, 0)),                # fused Q weight
                pl.BlockSpec((C, 2 * C), lambda b, q: (0, 0)),            # fused K|V weight
                pl.BlockSpec((num_heads, H, C), lambda b, q: (0, 0, 0)),  # per-head FFN weight
                pl.BlockSpec((1, C), lambda b, q: (0, 0)),                # FFN bias
            ],
            out_specs=pl.BlockSpec((1, q_block, C), lambda b, q: (b, q, 0)),
        ),
        compiler_params=pltpu.CompilerParams(
            dimension_semantics=("parallel", "parallel"),
            vmem_limit_bytes=32 * 1024 * 1024,
        ),
    )(xc, xc, wq_f, wkv_f, wff3, bff_2d)


def block_reference(x, wq, wk, wv, wff, bff, *, num_heads):
    """Pure-JAX reference matching the PyTorch module semantics."""
    B, T, C = x.shape
    H = C // num_heads
    scale = H ** (-0.5)
    causal = jnp.tril(jnp.ones((T, T), dtype=bool))
    outs = []
    for h in range(num_heads):
        q = x @ wq[h].T
        k = x @ wk[h].T
        v = x @ wv[h].T
        s = (q @ jnp.swapaxes(k, -2, -1)) * scale
        s = jnp.where(causal, s, -jnp.inf)
        p = jax.nn.softmax(s, axis=-1)
        outs.append(p @ v)
    cat = jnp.concatenate(outs, axis=-1)
    return jax.nn.relu(cat @ wff.T + bff)


if __name__ == "__main__":
    B, T, C, NH = 2, 16, 32, 4
    H = C // NH

    key = jax.random.PRNGKey(0)
    kx, kq, kk, kv, kw, kb = jax.random.split(key, 6)

    x = jax.random.normal(kx, (B, T, C), dtype=jnp.float32)
    # deterministic synthetic parameters (torch Linear layout: (out, in))
    wq = jax.random.normal(kq, (NH, H, C), dtype=jnp.float32) * 0.1
    wk = jax.random.normal(kk, (NH, H, C), dtype=jnp.float32) * 0.1
    wv = jax.random.normal(kv, (NH, H, C), dtype=jnp.float32) * 0.1
    wff = jax.random.normal(kw, (C, C), dtype=jnp.float32) * 0.1
    bff = jax.random.normal(kb, (C,), dtype=jnp.float32) * 0.1

    # q_block=8 -> grid (B=2, T//8=2): 4 parallel grid steps even at this toy size.
    out = block_forward(x, wq, wk, wv, wff, bff, num_heads=NH, q_block=8)
    out = jax.block_until_ready(out)

    ref = block_reference(x, wq, wk, wv, wff, bff, num_heads=NH)
    assert out.shape == (B, T, C)
    # tolerance covers the approx-reciprocal softmax normalization (EUP vrcp)
    assert jnp.allclose(out, ref, atol=5e-3, rtol=5e-3), "mismatch vs reference"

    print("KERNEL_OK")
</pallas_src>

<mosaic_0001>
module attributes {stable_mosaic.version = 11 : i64} {
  func.func @block_kernel(%arg0: i32, %arg1: i32, %arg2: memref<1x8x32xf32, #tpu.memory_space<vmem>>, %arg3: memref<1x16x32xf32, #tpu.memory_space<vmem>>, %arg4: memref<32x32xf32, #tpu.memory_space<vmem>>, %arg5: memref<32x64xf32, #tpu.memory_space<vmem>>, %arg6: memref<4x8x32xf32, #tpu.memory_space<vmem>>, %arg7: memref<1x32xf32, #tpu.memory_space<vmem>>, %arg8: memref<1x8x32xf32, #tpu.memory_space<vmem>>) attributes {dimension_semantics = [#tpu.dimension_semantics<parallel>, #tpu.dimension_semantics<parallel>], iteration_bounds = array<i64: 2, 2>, scalar_prefetch = 0 : i64, scratch_operands = 0 : i64, tpu.core_type = #tpu.core_type<tc>, window_params = [{transform_indices = @transform_0, window_bounds = array<i64: 1, 8, 32>}, {transform_indices = @transform_1, window_bounds = array<i64: 1, 16, 32>}, {pipeline_mode = #tpu.pipeline_mode<synchronous>, transform_indices = @transform_2, window_bounds = array<i64: 32, 32>}, {pipeline_mode = #tpu.pipeline_mode<synchronous>, transform_indices = @transform_3, window_bounds = array<i64: 32, 64>}, {pipeline_mode = #tpu.pipeline_mode<synchronous>, transform_indices = @transform_4, window_bounds = array<i64: 4, 8, 32>}, {pipeline_mode = #tpu.pipeline_mode<synchronous>, transform_indices = @transform_5, window_bounds = array<i64: 1, 32>}, {transform_indices = @transform_6, window_bounds = array<i64: 1, 8, 32>}]} {
    %c8_i32 = arith.constant 8 : i32
    %0 = arith.muli %arg1, %c8_i32 : i32
    %c0 = arith.constant 0 : index
    %c0_0 = arith.constant 0 : index
    %c0_1 = arith.constant 0 : index
    %1 = vector.load %arg2[%c0, %c0_0, %c0_1] : memref<1x8x32xf32, #tpu.memory_space<vmem>>, vector<1x8x32xf32>
    %2 = vector.shape_cast %1 : vector<1x8x32xf32> to vector<8x32xf32>
    %c0_2 = arith.constant 0 : index
    %c0_3 = arith.constant 0 : index
    %c0_4 = arith.constant 0 : index
    %3 = vector.load %arg3[%c0_2, %c0_3, %c0_4] : memref<1x16x32xf32, #tpu.memory_space<vmem>>, vector<1x16x32xf32>
    %4 = vector.shape_cast %3 : vector<1x16x32xf32> to vector<16x32xf32>
    %c0_5 = arith.constant 0 : index
    %c0_6 = arith.constant 0 : index
    %5 = vector.load %arg4[%c0_5, %c0_6] : memref<32x32xf32, #tpu.memory_space<vmem>>, vector<32x32xf32>
    %cst = arith.constant dense<0.000000e+00> : vector<8x32xf32>
    %6 = tpu.matmul %2, %5, %cst {dimension_numbers = #tpu.dot_dimension_numbers<[1], [0], [0], [1], [0, 0, 1, 1], [], []>} : vector<8x32xf32>, vector<32x32xf32>, vector<8x32xf32> -> vector<8x32xf32>
    %c0_7 = arith.constant 0 : index
    %c0_8 = arith.constant 0 : index
    %7 = vector.load %arg5[%c0_7, %c0_8] : memref<32x64xf32, #tpu.memory_space<vmem>>, vector<32x64xf32>
    %cst_9 = arith.constant dense<0.000000e+00> : vector<16x64xf32>
    %8 = tpu.matmul %4, %7, %cst_9 {dimension_numbers = #tpu.dot_dimension_numbers<[1], [0], [0], [1], [0, 0, 1, 1], [], []>} : vector<16x32xf32>, vector<32x64xf32>, vector<16x64xf32> -> vector<16x64xf32>
    %9 = vector.extract_strided_slice %6 {offsets = [0, 0], sizes = [8, 8], strides = [1, 1]} : vector<8x32xf32> to vector<8x8xf32>
    %10 = vector.extract_strided_slice %6 {offsets = [0, 8], sizes = [8, 8], strides = [1, 1]} : vector<8x32xf32> to vector<8x8xf32>
    %11 = vector.extract_strided_slice %6 {offsets = [0, 16], sizes = [8, 8], strides = [1, 1]} : vector<8x32xf32> to vector<8x8xf32>
    %12 = vector.extract_strided_slice %6 {offsets = [0, 24], sizes = [8, 8], strides = [1, 1]} : vector<8x32xf32> to vector<8x8xf32>
    %13 = vector.shape_cast %9 : vector<8x8xf32> to vector<1x8x8xf32>
    %14 = vector.shape_cast %10 : vector<8x8xf32> to vector<1x8x8xf32>
    %15 = vector.shape_cast %11 : vector<8x8xf32> to vector<1x8x8xf32>
    %16 = vector.shape_cast %12 : vector<8x8xf32> to vector<1x8x8xf32>
    %17 = tpu.concatenate %13, %14, %15, %16 in 0 : vector<1x8x8xf32>, vector<1x8x8xf32>, vector<1x8x8xf32>, vector<1x8x8xf32> -> vector<4x8x8xf32>
    %18 = vector.extract_strided_slice %8 {offsets = [0, 0], sizes = [16, 8], strides = [1, 1]} : vector<16x64xf32> to vector<16x8xf32>
    %19 = vector.extract_strided_slice %8 {offsets = [0, 8], sizes = [16, 8], strides = [1, 1]} : vector<16x64xf32> to vector<16x8xf32>
    %20 = vector.extract_strided_slice %8 {offsets = [0, 16], sizes = [16, 8], strides = [1, 1]} : vector<16x64xf32> to vector<16x8xf32>
    %21 = vector.extract_strided_slice %8 {offsets = [0, 24], sizes = [16, 8], strides = [1, 1]} : vector<16x64xf32> to vector<16x8xf32>
    %22 = vector.shape_cast %18 : vector<16x8xf32> to vector<1x16x8xf32>
    %23 = vector.shape_cast %19 : vector<16x8xf32> to vector<1x16x8xf32>
    %24 = vector.shape_cast %20 : vector<16x8xf32> to vector<1x16x8xf32>
    %25 = vector.shape_cast %21 : vector<16x8xf32> to vector<1x16x8xf32>
    %26 = tpu.concatenate %22, %23, %24, %25 in 0 : vector<1x16x8xf32>, vector<1x16x8xf32>, vector<1x16x8xf32>, vector<1x16x8xf32> -> vector<4x16x8xf32>
    %27 = vector.extract_strided_slice %8 {offsets = [0, 32], sizes = [16, 8], strides = [1, 1]} : vector<16x64xf32> to vector<16x8xf32>
    %28 = vector.extract_strided_slice %8 {offsets = [0, 40], sizes = [16, 8], strides = [1, 1]} : vector<16x64xf32> to vector<16x8xf32>
    %29 = vector.extract_strided_slice %8 {offsets = [0, 48], sizes = [16, 8], strides = [1, 1]} : vector<16x64xf32> to vector<16x8xf32>
    %30 = vector.extract_strided_slice %8 {offsets = [0, 56], sizes = [16, 8], strides = [1, 1]} : vector<16x64xf32> to vector<16x8xf32>
    %31 = vector.shape_cast %27 : vector<16x8xf32> to vector<1x16x8xf32>
    %32 = vector.shape_cast %28 : vector<16x8xf32> to vector<1x16x8xf32>
    %33 = vector.shape_cast %29 : vector<16x8xf32> to vector<1x16x8xf32>
    %34 = vector.shape_cast %30 : vector<16x8xf32> to vector<1x16x8xf32>
    %35 = tpu.concatenate %31, %32, %33, %34 in 0 : vector<1x16x8xf32>, vector<1x16x8xf32>, vector<1x16x8xf32>, vector<1x16x8xf32> -> vector<4x16x8xf32>
    %36 = tpu.iota {dimensions = array<i32: 0>} : vector<8x16xi32>
    %37 = vector.broadcast %0 : i32 to vector<8x16xi32>
    %38 = arith.addi %37, %36 : vector<8x16xi32>
    %39 = tpu.iota {dimensions = array<i32: 1>} : vector<8x16xi32>
    %40 = arith.cmpi sle, %39, %38 : vector<8x16xi32>
    %cst_10 = arith.constant 0.000000e+00 : f32
    %cst_11 = arith.constant -1.000000e+09 : f32
    %41 = vector.broadcast %cst_10 : f32 to vector<8x16xf32>
    %42 = vector.broadcast %cst_11 : f32 to vector<8x16xf32>
    %43 = arith.select %40, %41, %42 : vector<8x16xi1>, vector<8x16xf32>
    "tpu.trace_start"() <{level = 10 : i32, message = "hqd,hkd->hqk"}> : () -> ()
    %cst_12 = arith.constant dense<0.000000e+00> : vector<4x8x16xf32>
    %44 = tpu.matmul %17, %26, %cst_12 {dimension_numbers = #tpu.dot_dimension_numbers<[2], [2], [1], [1], [0, 0, 0, 1, 1, 1], [0], [0]>} : vector<4x8x8xf32>, vector<4x16x8xf32>, vector<4x8x16xf32> -> vector<4x8x16xf32>
    "tpu.trace_stop"() : () -> ()
    %45 = vector.shape_cast %43 : vector<8x16xf32> to vector<1x8x16xf32>
    %46 = vector.broadcast %45 : vector<1x8x16xf32> to vector<4x8x16xf32>
    %47 = arith.addf %44, %46 : vector<4x8x16xf32>
    %cst_13 = arith.constant dense<0xFF800000> : vector<4x8xf32>
    %48 = vector.multi_reduction <maximumf>, %47, %cst_13 [2] : vector<4x8x16xf32> to vector<4x8xf32>
    %49 = vector.shape_cast %48 : vector<4x8xf32> to vector<4x8x1xf32>
    %50 = vector.broadcast %49 : vector<4x8x1xf32> to vector<4x8x16xf32>
    %51 = arith.subf %47, %50 : vector<4x8x16xf32>
    %52 = math.exp %51 : vector<4x8x16xf32>
    %cst_14 = arith.constant dense<0.000000e+00> : vector<4x8xf32>
    %53 = vector.multi_reduction <add>, %52, %cst_14 [2] : vector<4x8x16xf32> to vector<4x8xf32>
    %54 = vector.shape_cast %53 : vector<4x8xf32> to vector<4x8x1xf32>
    %55 = tpu.reciprocal %54 {approx = true} : vector<4x8x1xf32> -> vector<4x8x1xf32>
    %56 = vector.broadcast %55 : vector<4x8x1xf32> to vector<4x8x16xf32>
    %57 = arith.mulf %52, %56 : vector<4x8x16xf32>
    "tpu.trace_start"() <{level = 10 : i32, message = "hqk,hkd->hqd"}> : () -> ()
    %cst_15 = arith.constant dense<0.000000e+00> : vector<4x8x8xf32>
    %58 = tpu.matmul %57, %35, %cst_15 {dimension_numbers = #tpu.dot_dimension_numbers<[2], [1], [1], [2], [0, 0, 0, 1, 1, 2], [0], [0]>} : vector<4x8x16xf32>, vector<4x16x8xf32>, vector<4x8x8xf32> -> vector<4x8x8xf32>
    "tpu.trace_stop"() : () -> ()
    %c0_16 = arith.constant 0 : index
    %c0_17 = arith.constant 0 : index
    %c0_18 = arith.constant 0 : index
    %59 = vector.load %arg6[%c0_16, %c0_17, %c0_18] : memref<4x8x32xf32, #tpu.memory_space<vmem>>, vector<4x8x32xf32>
    "tpu.trace_start"() <{level = 10 : i32, message = "hqd,hdc->hqc"}> : () -> ()
    %cst_19 = arith.constant dense<0.000000e+00> : vector<4x8x32xf32>
    %60 = tpu.matmul %58, %59, %cst_19 {dimension_numbers = #tpu.dot_dimension_numbers<[2], [1], [1], [2], [0, 0, 0, 1, 1, 2], [0], [0]>} : vector<4x8x8xf32>, vector<4x8x32xf32>, vector<4x8x32xf32> -> vector<4x8x32xf32>
    "tpu.trace_stop"() : () -> ()
    %cst_20 = arith.constant dense<0.000000e+00> : vector<8x32xf32>
    %61 = vector.multi_reduction <add>, %60, %cst_20 [0] : vector<4x8x32xf32> to vector<8x32xf32>
    %c0_21 = arith.constant 0 : index
    %c0_22 = arith.constant 0 : index
    %62 = vector.load %arg7[%c0_21, %c0_22] : memref<1x32xf32, #tpu.memory_space<vmem>>, vector<1x32xf32>
    %63 = vector.broadcast %62 : vector<1x32xf32> to vector<8x32xf32>
    %64 = arith.addf %61, %63 : vector<8x32xf32>
    %cst_23 = arith.constant 0.000000e+00 : f32
    %65 = vector.broadcast %cst_23 : f32 to vector<8x32xf32>
    %66 = arith.maximumf %64, %65 : vector<8x32xf32>
    %c0_24 = arith.constant 0 : index
    %c0_25 = arith.constant 0 : index
    %c0_26 = arith.constant 0 : index
    %67 = vector.load %arg8[%c0_24, %c0_25, %c0_26] : memref<1x8x32xf32, #tpu.memory_space<vmem>>, vector<1x8x32xf32>
    %68 = vector.shape_cast %67 : vector<1x8x32xf32> to vector<8x32xf32>
    %69 = vector.shape_cast %66 : vector<8x32xf32> to vector<1x8x32xf32>
    tpu.vector_store %arg8[%c0_24, %c0_25, %c0_26], %69 {strides = array<i32>} : memref<1x8x32xf32, #tpu.memory_space<vmem>>, vector<1x8x32xf32>,
    return
  }
  func.func @transform_0(%arg0: i32, %arg1: i32) -> (i32, i32, i32) {
    %c0_i32 = arith.constant 0 : i32
    %c0_i32_0 = arith.constant 0 : i32
    return %arg0, %arg1, %c0_i32 : i32, i32, i32
  }
  func.func @transform_1(%arg0: i32, %arg1: i32) -> (i32, i32, i32) {
    %c0_i32 = arith.constant 0 : i32
    %c0_i32_0 = arith.constant 0 : i32
    %c0_i32_1 = arith.constant 0 : i32
    return %arg0, %c0_i32, %c0_i32_0 : i32, i32, i32
  }
  func.func @transform_2(%arg0: i32, %arg1: i32) -> (i32, i32) {
    %c0_i32 = arith.constant 0 : i32
    %c0_i32_0 = arith.constant 0 : i32
    %c0_i32_1 = arith.constant 0 : i32
    return %c0_i32, %c0_i32_0 : i32, i32
  }
  func.func @transform_3(%arg0: i32, %arg1: i32) -> (i32, i32) {
    %c0_i32 = arith.constant 0 : i32
    %c0_i32_0 = arith.constant 0 : i32
    %c0_i32_1 = arith.constant 0 : i32
    return %c0_i32, %c0_i32_0 : i32, i32
  }
  func.func @transform_4(%arg0: i32, %arg1: i32) -> (i32, i32, i32) {
    %c0_i32 = arith.constant 0 : i32
    %c0_i32_0 = arith.constant 0 : i32
    %c0_i32_1 = arith.constant 0 : i32
    %c0_i32_2 = arith.constant 0 : i32
    return %c0_i32, %c0_i32_0, %c0_i32_1 : i32, i32, i32
  }
  func.func @transform_5(%arg0: i32, %arg1: i32) -> (i32, i32) {
    %c0_i32 = arith.constant 0 : i32
    %c0_i32_0 = arith.constant 0 : i32
    %c0_i32_1 = arith.constant 0 : i32
    return %c0_i32, %c0_i32_0 : i32, i32
  }
  func.func @transform_6(%arg0: i32, %arg1: i32) -> (i32, i32, i32) {
    %c0_i32 = arith.constant 0 : i32
    %c0_i32_0 = arith.constant 0 : i32
    return %arg0, %arg1, %c0_i32 : i32, i32, i32
  }
}

</mosaic_0001>

<bundles_post_ra>
// kernel: tpu_custom_call.1
= control target key start
LH: loop header
LB: loop body
LE: loop exit
PB: predicated region body
PF: predicated region fallthrough
CT: control target
= control target key end

     0   :  { %s2994_s0 = inlined_call_operand.hbm [shape: f32[2,16,32], index: 0, kind: input, shape index: {}]   ;;  %s2995_s1 = inlined_call_operand.hbm [shape: f32[2,16,32], index: 1, kind: input, shape index: {}]   ;;  %s2996_s2 = inlined_call_operand.hbm [shape: f32[32,32], index: 2, kind: input, shape index: {}]   ;;  %s2997_s3 = inlined_call_operand.hbm [shape: f32[32,64], index: 3, kind: input, shape index: {}]   ;;  %s2998_s4 = inlined_call_operand.hbm [shape: f32[4,8,32], index: 4, kind: input, shape index: {}]   ;;  %s2999_s5 = inlined_call_operand.vmem [shape: f32[1,32], index: 5, kind: input, shape index: {}]   ;;  %s3000_s6 = inlined_call_operand.hbm [shape: f32[2,16,32], index: 6, kind: output, shape index: {}]  }
   0x1   :  { %3013 = sst [smem:[#allocation21_spill]] %s2994_s0 }
   0x2   :  { %3014 = sst [smem:[#allocation22_spill]] %s2996_s2 }
   0x3   :  { %3015 = sst [smem:[#allocation23_spill]] %s2997_s3 }
   0x4   :  { %3016 = sst [smem:[#allocation24_spill]] %s2998_s4 }
   0x5   :  { %3017 = sst [smem:[#allocation25_spill]] %s2999_s5 }
   0x6   :  { %3018 = sst [smem:[#allocation26_spill]] %s3000_s6 }
   0x7   :  { %11 = vsyncpa [#allocation3], 0 }
   0x8   :  { %13 = vsyncpa [#allocation3 + $0x1], 0 }
   0x9   :  { %14 = vsyncpa [#allocation6], 0 }
   0xa   :  { %16 = vsyncpa [#allocation6 + $0x1], 0 }
   0xb   :  { %17 = vsyncpa [#allocation9], 0 }
   0xc   :  { %18 = vsyncpa [#allocation4], 0 }
   0xd   :  { %20 = vsyncpa [#allocation4 + $0x1], 0  ;;  %s2459_s21 = smov 0   ;;  %s2461_s22 = smov 0  }
   0xe   :  { %s2463_s23 = smov 0   ;;  %s2465_s24 = smov 0  }
   0xf   :  { %s2467_s25 = smov 0   ;;  %s2469_s26 = smov 0  }
  0x10   :  { %s2471_s27 = smov 0   ;;  %s2473_s28 = smov 0  }
  0x11   :  { %s2475_s29 = smov 0   ;;  %s2477_s30 = smov 0  }
  0x12   :  { %s2479_s7 = smov 0  }
  0x13 LB: > { %3019 = sst [smem:[#allocation17_spill]] %s2390_s27  ;;  %s2513_s8 = sadd.s32 4294967295, %s2406_s7   ;;  %s2406_s7 = sphi %s2479_s7, %s26_s7   ;;  %s2402_s30 = sphi %s2477_s30, %s3068_s30   ;;  %s2398_s29 = sphi %s2475_s29, %s3067_s29   ;;  %s2394_s28 = sphi %s2473_s28, %s3066_s28   ;;  %s2390_s27 = sphi %s2471_s27, %s3065_s27   ;;  %s2386_s26 = sphi %s2469_s26, %s3064_s26   ;;  %s2382_s25 = sphi %s2467_s25, %s3063_s25   ;;  %s2378_s24 = sphi %s2465_s24, %s3062_s24   ;;  %s2374_s23 = sphi %s2463_s23, %s3061_s23   ;;  %s2370_s22 = sphi %s2461_s22, %s3060_s22   ;;  %s2366_s21 = sphi %s2459_s21, %s3059_s21  }
  0x14   : > { %3020 = sst [smem:[#allocation18_spill]] %s2394_s28  ;;  %p86_p0 = scmp.ne.s32.totalorder %s2370_s22, %s2366_s21 }
  0x15   : > { %p3002_p1 = scmp.eq.s32.totalorder %s2513_s8, 0  ;;  %p1697_p2 = scmp.ge.s32.totalorder %s2406_s7, 1 }
  0x16   : > { %p209_p3 = scmp.lt.s32.totalorder %s2406_s7, 5  ;;  %s2408_s11 = smov [#allocation7]  }
  0x17   : > { %p2521_p4 = por %p86_p0, %p3002_p1  ;;  %s221_s12 = sshll.u32 %s2408_s11, 4  ;;  %s2529_s12 = int_to_ptr.vmem [resolvable:$true] %s221_s12 }
  0x18   : > { %p2525_p5 = pnand %p1697_p2, %p209_p3  ;;  %s2409_s14 = smov [#allocation8]  }
  0x19   : > { %s3021_s9 = scalar_select %p2521_p4, 1, 0 }
  0x1a   : > { %s3023_s10 = scalar_select %p2525_p5, 1, 0 }
  0x1b   : > { %3022 = sst [smem:[#allocation19_spill]] %s3021_s9  ;;  %p1947_p6 = pneg %p2525_p5 }
  0x1c   : > { %s234_s15 = sshll.u32 %s2409_s14, 4  ;;  %s2410_s16 = smov [#allocation10]   ;;  %s2539_s15 = int_to_ptr.vmem [resolvable:$true] %s234_s15 }
  0x1d   : > { %p2535_p7 = pnand %p1947_p6, %p3002_p1  ;;  %s2541_s17 = sshll.u32 %s2410_s16, 4  ;;  %s248_s17 = int_to_ptr.vmem [resolvable:$true] %s2541_s17 }
  0x1e   : > { %s3025_s2 = sld [smem:[#allocation22_spill]] }
  0x1f   : > { %p2551_p9 = pneg %p2535_p7 }
  0x24   : > { %s2128_s20 = scalar_lea.hbm %s3025_s2, 512 }
  0x25   : > { %p2129_p8 = scmp.ne.s32.totalorder %s3025_s2, %s2128_s20  ;;  %p2135_p12 = scmp.lt.u32.totalorder %s2128_s20, %s3025_s2 }
  0x27   : > { %p2131_p10 = pnand %p2551_p9, %p2129_p8 }
  0x29   : > { %p2132_p11 = pneg %p2131_p10 }
  0x2b   : > { %p2137_p13 = pnand %p2135_p12, %p2132_p11 }
  0x2d   : > { %2140 = shalt.err (!%p2137_p13)
}
  0x2e   : > { %s2141_s18 = scalar_lea.vmem %s2529_s12, 512  ;;  %p2149_p6 = scmp.lt.s32.totalorder %s2529_s12, %s2529_s12 }
  0x2f   : > { %p2142_p0 = scmp.ne.s32.totalorder %s2529_s12, %s2141_s18  ;;  %p2150_p1 = scmp.lt.s32.totalorder %s2141_s18, %s2141_s18 }
  0x31   : > { %p2144_p2 = pnand %p2142_p0, %p2551_p9  ;;  %p2151_p8 = por %p2150_p1, %p2149_p6 }
  0x33   : > { %p2145_p3 = pneg %p2144_p2 }
  0x35   : > { %p2152_p10 = pnand %p2151_p8, %p2145_p3 }
  0x37   : > { %2155 = shalt.err (!%p2152_p10)
}
  0x38   : > { %s3008_s19 = smov 128   ;;  %s3009_s20 = smov 8  }
  0x39   : > { %1950 = dma.hbm_to_vmem [thread:$0]  (!%p2535_p7), %s3025_s2, 512, %s2529_s12, [#allocation6], %s3008_s19, %s3008_s19, %s3009_s20  }
  0x3a   : > { %s3027_s3 = sld [smem:[#allocation23_spill]] }
  0x40   : > { %s2156_s18 = scalar_lea.hbm %s3027_s3, 512 }
  0x41   : > { %p2157_p1 = scmp.ne.s32.totalorder %s3027_s3, %s2156_s18  ;;  %p2163_p13 = scmp.lt.u32.totalorder %s2156_s18, %s3027_s3 }
  0x43   : > { %p2159_p11 = pnand %p2157_p1, %p2551_p9 }
  0x45   : > { %p2160_p12 = pneg %p2159_p11 }
  0x47   : > { %p2165_p0 = pnand %p2163_p13, %p2160_p12 }
  0x49   : > { %2168 = shalt.err (!%p2165_p0)
}
  0x4a   : > { %s2169_s12 = scalar_lea.vmem %s2539_s15, 512  ;;  %p2177_p8 = scmp.lt.s32.totalorder %s2539_s15, %s2539_s15 }
  0x4b   : > { %p2170_p2 = scmp.ne.s32.totalorder %s2539_s15, %s2169_s12  ;;  %p2178_p10 = scmp.lt.s32.totalorder %s2169_s12, %s2169_s12 }
  0x4d   : > { %p2172_p3 = pnand %p2170_p2, %p2551_p9  ;;  %p2179_p1 = por %p2178_p10, %p2177_p8 }
  0x4f   : > { %p2173_p6 = pneg %p2172_p3 }
  0x51   : > { %p2180_p11 = pnand %p2179_p1, %p2173_p6 }
  0x53   : > { %2183 = shalt.err (!%p2180_p11)
}
  0x54   : > { %1953 = dma.hbm_to_vmem [thread:$0]  (!%p2535_p7), %s3027_s3, 512, %s2539_s15, [#allocation9], %s3008_s19, %s3008_s19, %s3009_s20  }
  0x55   : > { %s3028_s4 = sld [smem:[#allocation24_spill]] }
  0x5b   : > { %s2184_s21 = scalar_lea.hbm %s3028_s4, 512 }
  0x5c   : > { %p2185_p12 = scmp.ne.s32.totalorder %s3028_s4, %s2184_s21  ;;  %p2191_p2 = scmp.lt.u32.totalorder %s2184_s21, %s3028_s4 }
  0x5e   : > { %p2187_p13 = pnand %p2185_p12, %p2551_p9 }
  0x60   : > { %p2188_p0 = pneg %p2187_p13 }
  0x62   : > { %p2193_p3 = pnand %p2191_p2, %p2188_p0 }
  0x64   : > { %2196 = shalt.err (!%p2193_p3)
}
  0x65   : > { %s2197_s12 = scalar_lea.vmem %s248_s17, 512  ;;  %p2205_p1 = scmp.lt.s32.totalorder %s248_s17, %s248_s17 }
  0x66   : > { %p2198_p6 = scmp.ne.s32.totalorder %s248_s17, %s2197_s12  ;;  %p2206_p11 = scmp.lt.s32.totalorder %s2197_s12, %s2197_s12 }
  0x68   : > { %p2200_p8 = pnand %p2198_p6, %p2551_p9  ;;  %p2207_p4 = por %p2206_p11, %p2205_p1 }
  0x6a   : > { %p2201_p10 = pneg %p2200_p8 }
  0x6c   : > { %p2208_p5 = pnand %p2207_p4, %p2201_p10 }
  0x6e   : > { %2211 = shalt.err (!%p2208_p5)
}
  0x6f   : > { %1956 = dma.hbm_to_vmem [thread:$0]  (!%p2535_p7), %s3028_s4, 512, %s248_s17, [#allocation9], %s3008_s19, %s3008_s19, %s3009_s20  }
  0x70   : > { %s1696_s6 = sadd.s32 4294967294, %s2406_s7   ;;  %s35_s13 = sadd.s32 1, %s2398_s29 }
  0x71   : > { %s38_s27 = sadd.s32 1, %s2402_s30  ;;  %p36_p4 = scmp.ge.s32.totalorder %s35_s13, 2 }
  0x72   : > { %s47_s28 = sadd.s32 1, %s2386_s26  ;;  %p54_p5 = scmp.ne.s32.totalorder %s2386_s26, %s2382_s25 }
  0x73   : > { %p55_p9 = scmp.eq.s32.totalorder %s2406_s7, 0  ;;  %s3070_s13 = smov (%p36_p4, %s35_s13), 0 }
  0x74   : > { %s3072_s27 = smov (!%p36_p4, %s38_s27), %s2402_s30  ;;  %s43_s17 = ssub.s32 %s2398_s29, %s3070_s13 }
  0x75   : > { %p2638_p7 = por %p55_p9, %p54_p5  ;;  %p40_p12 = scmp.ge.s32.totalorder %s3072_s27, 2 }
  0x76   : > { %p60_p13 = scmp.ne.s32.totalorder %s2382_s25, %s2378_s24  ;;  %s73_s21 = sadd.s32 1, %s2374_s23 }
  0x77   : > { %p80_p0 = scmp.ne.s32.totalorder %s2374_s23, %s2370_s22  ;;  %s3074_s27 = smov (%p40_p12, %s3072_s27), 0 }
  0x78   : > { %3030 = sst [smem:[#allocation20_spill]] %s3074_s27  ;;  %p3031_p2 = scmp.eq.s32.totalorder %s2513_s8, 0 }
  0x79   : > { %p2658_p6 = por %p80_p0, %p55_p9  ;;  %s42_s16 = ssub.s32 %s2402_s30, %s3074_s27 }
  0x7a   : > { %p2654_p3 = por %p3031_p2, %p60_p13  ;;  %p196_p8 = scmp.eq.s32.totalorder %s2513_s8, 3 }
  0x7b   : > { %s44_s18 = sor.u32 %s43_s17, %s42_s16  ;;  %p71_p10 = scmp.eq.s32.totalorder %s42_s16, 0 }
  0x7c   : > { %s3032_s11 = scalar_select %p2654_p3, 1, 0 }
  0x7d   : > { %p45_p1 = scmp.eq.s32.totalorder %s44_s18, 0  ;;  %p2668_p11 = por %p196_p8, %p54_p5 }
  0x7e   : > { %s2673_s15 = scalar_select %p71_p10, %s2374_s23, %s73_s21  }
  0x7f   : > { %s3034_s12 = scalar_select %p2668_p11, 1, 0 }
  0x80   : > { %s2676_s5 = scalar_select %p45_p1, %s2386_s26, %s47_s28  }
  0x81   : > { %p202_p4 = scmp.eq.s32.totalorder %s1696_s6, 3  ;;  %p1971_p9 = scmp.lt.s32.totalorder %s2406_s7, 4 }
  0x82   : > { %s264_s19 = sand.u32 1, %s2386_s26   ;;  %s1703_s20 = sshll.u32 %s2402_s30, 1 }
  0x83   : > { %p2684_p12 = por %p202_p4, %p60_p13  ;;  %s1702_s16 = sshll.u32 %s264_s19, 3 }
  0x84   : > { %s273_s18 = sadd.s32 %s2398_s29, %s1703_s20  ;;  %s3036_s0 = sld [smem:[#allocation21_spill]] }
  0x85   : > { %s3035_s17 = scalar_select %p2684_p12, 1, 0 }
  0x86   : > { %s1704_s2 = sshll.u32 %s273_s18, 7  ;;  %s268_s6 = scalar_lea.vmem [#allocation2], %s1702_s16 }
  0x87   : > { %s277_s28 = sshll.u32 %s268_s6, 4  ;;  %p2698_p5 = pnand %p1971_p9, %p2638_p7  ;;  %s2694_s28 = int_to_ptr.vmem [resolvable:$true] %s277_s28 }
  0x88   : > { %p2704_p13 = pnand %p1971_p9, %p2658_p6  ;;  %s265_s4 = scalar_lea.sflag [#allocation3], %s264_s19 }
  0x89   : > { %p2214_p2 = pneg %p2698_p5 }
  0x8a   : > { %s2692_s21 = scalar_lea.hbm %s3036_s0, %s1704_s2  ;;  %s2217_s14 = scalar_lea.hbm %s3036_s0, 512 }
  0x8b   : > { %s2212_s20 = scalar_lea.hbm %s2692_s21, 128  ;;  %p2218_p6 = scmp.lt.u32.totalorder %s2692_s21, %s3036_s0 }
  0x8c   : > { %p2213_p0 = scmp.ne.s32.totalorder %s2692_s21, %s2212_s20  ;;  %p2219_p10 = scmp.lt.u32.totalorder %s2217_s14, %s2212_s20 }
  0x8d   : > { %p2221_p4 = scmp.lt.u32.totalorder %s2212_s20, %s2692_s21 }
  0x8e   : > { %p2215_p8 = pnand %p2214_p2, %p2213_p0  ;;  %p2220_p1 = por %p2219_p10, %p2218_p6 }
  0x90   : > { %p2216_p7 = pneg %p2215_p8  ;;  %p2222_p9 = por %p2221_p4, %p2220_p1 }
  0x92   : > { %p2223_p12 = pnand %p2222_p9, %p2216_p7 }
  0x94   : > { %2226 = shalt.err (!%p2223_p12)
}
  0x95   : > { %s2227_s19 = scalar_lea.vmem %s2694_s28, 128  ;;  %s2413_s9 = smov [#allocation2]  }
  0x96   : > { %p2228_p0 = scmp.ne.s32.totalorder %s2694_s28, %s2227_s19  ;;  %s2232_s16 = sshll.u32 %s2413_s9, 4  ;;  %s2233_s16 = int_to_ptr.vmem [resolvable:$false] %s2232_s16 }
  0x97   : > { %s2234_s18 = scalar_lea.vmem %s2233_s16, 256  ;;  %p2235_p3 = scmp.lt.s32.totalorder %s2694_s28, %s2233_s16 }
  0x98   : > { %p2230_p8 = pnand %p2228_p0, %p2214_p2  ;;  %p2236_p6 = scmp.lt.s32.totalorder %s2234_s18, %s2227_s19 }
  0x9a   : > { %p2231_p11 = pneg %p2230_p8  ;;  %p2237_p10 = por %p2236_p6, %p2235_p3 }
  0x9c   : > { %p2238_p1 = pnand %p2237_p10, %p2231_p11 }
  0x9e   : > { %2241 = shalt.err (!%p2238_p1)
}
  0x9f   : > { %1960 = dma.hbm_to_vmem [thread:$0]  (!%p2698_p5), %s2692_s21, 128, %s2694_s28, %s265_s4  }
  0xa0   : > { %s286_s20 = sand.u32 1, %s2374_s23   ;;  %s1745_s6 = sshll.u32 %s2402_s30, 8 }
  0xa1   : > { %s1705_s14 = sshll.u32 %s286_s20, 4  ;;  %s2739_s19 = scalar_lea.hbm %s2995_s1, %s1745_s6 }
  0xa2   : > { %s288_s27 = scalar_lea.vmem [#allocation5], %s1705_s14  ;;  %s3039_s18 = sand.u32 1, %s2406_s7  }
  0xa3   : > { %s295_s16 = sshll.u32 %s288_s27, 4  ;;  %s2745_s0 = scalar_lea.sflag [#allocation6], %s3039_s18  ;;  %s2741_s16 = int_to_ptr.vmem [resolvable:$true] %s295_s16 }
  0xa4   : > { %s2242_s21 = scalar_lea.hbm %s2739_s19, 256  ;;  %p2244_p11 = pneg %p2704_p13 }
  0xa5   : > { %p2243_p3 = scmp.ne.s32.totalorder %s2739_s19, %s2242_s21  ;;  %s2247_s4 = scalar_lea.hbm %s2995_s1, 512 }
  0xa6   : > { %p2248_p2 = scmp.lt.u32.totalorder %s2739_s19, %s2995_s1  ;;  %p2249_p7 = scmp.lt.u32.totalorder %s2247_s4, %s2242_s21 }
  0xa7   : > { %p2245_p12 = pnand %p2244_p11, %p2243_p3  ;;  %p2251_p9 = scmp.lt.u32.totalorder %s2242_s21, %s2739_s19 }
  0xa8   : > { %p2250_p4 = por %p2249_p7, %p2248_p2 }
  0xa9   : > { %p2246_p5 = pneg %p2245_p12 }
  0xaa   : > { %p2252_p0 = por %p2251_p9, %p2250_p4 }
  0xac   : > { %p2253_p8 = pnand %p2252_p0, %p2246_p5 }
  0xae   : > { %2256 = shalt.err (!%p2253_p8)
}
  0xaf   : > { %s2257_s6 = scalar_lea.vmem %s2741_s16, 256  ;;  %s2414_s9 = smov [#allocation5]  }
  0xb0   : > { %p2258_p6 = scmp.ne.s32.totalorder %s2741_s16, %s2257_s6  ;;  %s2262_s27 = sshll.u32 %s2414_s9, 4  ;;  %s2263_s27 = int_to_ptr.vmem [resolvable:$false] %s2262_s27 }
  0xb1   : > { %s2264_s18 = scalar_lea.vmem %s2263_s27, 512  ;;  %p2265_p3 = scmp.lt.s32.totalorder %s2741_s16, %s2263_s27 }
  0xb2   : > { %p2260_p10 = pnand %p2258_p6, %p2244_p11  ;;  %p2266_p12 = scmp.lt.s32.totalorder %s2264_s18, %s2257_s6 }
  0xb4   : > { %p2261_p1 = pneg %p2260_p10  ;;  %p2267_p2 = por %p2266_p12, %p2265_p3 }
  0xb6   : > { %p2268_p7 = pnand %p2267_p2, %p2261_p1 }
  0xb8   : > { %2271 = shalt.err (!%p2268_p7)
}
  0xb9   : > { %s3040_s21 = smov 8   ;;  %s3041_s28 = smov 128  }
  0xba   : > { %1963 = dma.hbm_to_vmem [thread:$0]  (!%p2704_p13), %s2739_s19, 256, %s2741_s16, %s2745_s0, %s3041_s28, %s3041_s28, %s3040_s21  }
  0xbb   : > { %p3042_p11 = scmp.ne.s32.totalorder %s3023_s10, 0 }
  0xbc   : > { %s2779_s2 = sand.u32 (!%p3042_p11), 1, %s2382_s25   ;;  %p3043_p5 = scmp.ne.s32.totalorder (!%p3042_p11), %s3032_s11, 0 }
  0xbd   : > { %307 = sbr.rel (%p3042_p11) target bundleno = 1547 (0x60b), region = 44  ;;  %s1709_s4 = sshll.u32 (!%p3042_p11), %s2779_s2, 3 }
  0xbe   : > { %s310_s20 = scalar_lea.sflag (!%p3042_p11), [#allocation3], %s2779_s2  ;;  %s2785_s3 = scalar_lea.vmem (!%p3042_p11), [#allocation2], %s1709_s4 }
  0xc4   : > { %2345 = dma.done.wait (%p3043_p5), %s310_s20, 128  }
  0xc5   : > { %2347 = vsyncadd (%p3043_p5), %s310_s20, 4294967168  ;;  %s3044_s0 = sld [smem:[#allocation19_spill]]  ;;  %s318_s10 = sand.u32 1, %s2513_s8  }
  0xc6   : > { %s320_s19 = sand.u32 1, %s2370_s22   ;;  %s319_s14 = scalar_lea.sflag [#allocation6], %s318_s10 }
  0xc7   : > { %s2793_s16 = sshll.u32 %s320_s19, 4 }
  0xc8   : > { %s322_s6 = scalar_lea.vmem [#allocation5], %s2793_s16 }
  0xcb   : > { %p3045_p13 = scmp.ne.s32.totalorder %s3044_s0, 0 }
  0xcd   : > { %2349 = dma.done.wait (%p3045_p13), %s319_s14, 256  }
  0xce   : > { %2351 = vsyncadd (%p3045_p13), %s319_s14, 4294967040  ;;  %p3046_p4 = scmp.eq.s32.totalorder %s2513_s8, 0 }
  0xd0   : > { %2353 = dma.done.wait (%p3046_p4), [#allocation6], 512   ;;  %p3047_p9 = pmov %p3046_p4 }
  0xd1   : > { %p3048_p0 = pmov %p3046_p4 }
  0xd2   : > { %2355 = vsyncadd (%p3047_p9), [#allocation6], 4294966784 }
  0xd3   : > { %2357 = dma.done.wait (%p3048_p0), [#allocation9], 1024   ;;  %p3049_p8 = pmov %p3048_p0 }
  0xd4   : > { %v2415_v0 = vmov 0.0|0.0   ;;  %vm2416_vm0 = vmmov 0   ;;  %v2417_v1 = vmov 0.0   ;;  %vm376_vm1 = vcmask 261120   ;;  %v450_v2 = vld [vmem:[#allocation8] sm:$0xff]  ;;  %v451_v3 = vld [vmem:[#allocation8 + $0x8] sm:$0xff] }
  0xd5   : > { %2359 = vsyncadd (%p3049_p8), [#allocation9], 4294966272  ;;  %1887 = vmatprep.subr.bf16.mxu0 %v2415_v0  ;;  %1797 = vmatprep.mubr.msk.f32.mxu0 %vm2416_vm0, %v2417_v1  ;;  %v452_v4 = vld [vmem:[#allocation8 + $0x10] sm:$0xff]  ;;  %v1893_v5 = vpack.c.bf16 %v451_v3, %v450_v2  ;;  %v453_v6 = vld [vmem:[#allocation8 + $0x18] sm:$0xff]  ;;  %vm564_vm2 = vcmask 64512   ;;  %s2418_s8 = smov 104   ;;  %v556_v39 = vlaneseq }
  0xd6   : > { %v370_v7 = vld [vmem:[%s322_s6] sm:$0xff]  ;;  %v1897_v8 = vpack.c.bf16 %v453_v6, %v452_v4  ;;  %v373_v10 = vld [vmem:[#allocation7 + $0x8] sm:$0xff]  ;;  %v375_v13 = vld [vmem:[#allocation7 + $0x18] sm:$0xff]  ;;  %s2419_s11 = smov 120   ;;  %s2420_s9 = smov 112   ;;  %vm869_vm5 = vcmask 130048  }
  0xd7   : > { %1808 = vmatprep.mubr.msk.f32.mxu1 %vm376_vm1, %v370_v7  ;;  %v372_v9 = vld [vmem:[#allocation7] sm:$0xff]  ;;  %v374_v11 = vld [vmem:[#allocation7 + $0x10] sm:$0xff]  ;;  %1894 = vmatprep.subr.bf16.mxu1 %v1893_v5  ;;  %v371_v15 = vld [vmem:[%s322_s6 + $0x8] sm:$0xff]  ;;  %s3052_s27 = sld [smem:[#allocation17_spill]]  ;;  %v557_v40 = vshrl.u32 %v556_v39, 7  ;;  %v561_v43 = vand.u32 127, %v556_v39 }
  0xd8   : > { %v1888_v12 = vpack.c.bf16 %v373_v10, %v372_v9  ;;  %1896 = vmatpush3.bf16.msra.mxu1 %v1893_v5  ;;  %v1891_v14 = vpack.c.bf16 %v375_v13, %v374_v11  ;;  %v369_v16 = vld [vmem:[%s2785_s3] sm:$0xff]  ;;  %vm2830_vm3 = vmpackc.low %vm564_vm2, %vm564_vm2  ;;  %v2421_v44 = vmov -1e+09   ;;  %s2422_s21 = smov 96   ;;  %s3053_s28 = sld [smem:[#allocation18_spill]] }
  0xd9   : > { %1898 = vmatprep.subr.bf16.mxu1 %v1897_v8  ;;  %s3054_s19 = sld [smem:[#allocation25_spill]]  ;;  %s367_s14 = scalar_lea.vmem [#allocation11], %s1709_s4 }
  0xda   : > { %1889 = vmatpush3.bf16.msra.mxu0 %v1888_v12  ;;  %s1559_s6 = sshll.u32 %s367_s14, 4  ;;  %p3056_p10 = scmp.ne.s32.totalorder %s3034_s12, 0  ;;  %s2932_s6 = int_to_ptr.vmem [resolvable:$true] %s1559_s6 }
  0xdb   : > { %1890 = vmatprep.subr.bf16.mxu0 %v2415_v0  ;;  %s2423_s4 = smov [#allocation11]  }
  0xdc   : > { %1900 = vmatpush3.bf16.msra.mxu1 %v1897_v8 }
  0xdd   : > { %1905 = vmatprep.subr.bf16.mxu1 %v2415_v0  ;;  %s1715_s18 = sshll.u32 %s3052_s27, 3 }
  0xde   : > { %1892 = vmatpush3.bf16.msra.mxu0 %v1891_v14  ;;  %v558_v41 = vstv %s1715_s18  ;;  %s1741_s20 = sshll.u32 %s3053_s28, 1  ;;  %s2276_s28 = sshll.u32 %s2423_s4, 4  ;;  %s2277_s28 = int_to_ptr.vmem [resolvable:$false] %s2276_s28 }
  0xdf   : > { %1901 = vmatprep.subr.bf16.mxu0 %v2415_v0  ;;  %1809 = vmatmul.mubr.msk.f32.vlgmr.msra.gmra.mrb[0].mxu1 %vm376_vm1, %v371_v15  ;;  %v559_v42 = vadd.s32 %v558_v41, %v557_v40  ;;  %s1555_s3 = sadd.s32 %s3052_s27, %s1741_s20  ;;  %s1544_s27 = scalar_lea.sflag [#allocation4], %s2779_s2 }
  0xe0   : > { %1822 = vmatprep.mubr.msk.f32.mxu1 %vm2416_vm0, %v2417_v1  ;;  %s1742_s16 = sshll.u32 %s1555_s3, 7  ;;  %s2278_s20 = scalar_lea.vmem %s2277_s28, 256 }
  0xe1   : > { %1798 = vmatmul.mubr.msk.f32.vlgmr.msra.gmra.mrb[0].mxu0 %vm376_vm1, %v369_v16  ;;  %vm562_vm4 = vcmp.le.s32.totalorder %v561_v43, %v559_v42  ;;  %p2279_p12 = scmp.lt.s32.totalorder %s2932_s6, %s2277_s28 }
  0xe2   : > { %1815 = vmatprep.mubr.msk.f32.mxu0 %vm2416_vm0, %v2417_v1  ;;  %v563_v45 = vsel %vm562_vm4, 0.0, %v2421_v44  ;;  %v1230_v44 = vld [vmem:[#allocation10] sm:$0xff] }
 0x1b2   : > { %v1810_v17 = vpop.f32.mrb[0].mxu1 }
 0x1b3   : > { %v526_v18 = vpop.f32.mrb[1].mxu1 }
 0x1b4   : > { %v446_v19 = vpop.f32.mrb[0].mxu0  ;;  %v1902_v20 = vpack.c.bf16 %v1810_v17, %v526_v18  ;;  %v2826_v21 = vpack.i.bf16 %v1810_v17, %v526_v18 }
 0x1b5   : > { %v1799_v23 = vpop.f32.mrb[1].mxu0 }
 0x1b6   : > { %2088 = vrot.lane.b32.xlu1 %v2826_v21, %s2418_s8  ;;  %2078 = vrot.lane.b32.xlu0 %v2826_v21, %s2419_s11 }
 0x1b7   : > { %1904 = vmatpush3.bf16.xpose.msk.msra.mxu0 %vm2830_vm3, %v1902_v20 }
 0x1b8   : > { %1909 = vmatprep.subr.bf16.mxu0 %v2415_v0 }
 0x1ba   : > { %2083 = vrot.lane.b32.xlu0 %v2826_v21, %s2420_s9  ;;  %536 = vrot.lane.b32.xlu1 %v446_v19, %s2419_s11 }
 0x1be   : > { %1816 = vmatmul.mubr.msk.f32.vlgmr.msra.gmra.mrb[2].mxu0 %vm564_vm2, %v446_v19  ;;  %538 = vrot.lane.b32.xlu0 %v446_v19, %s2420_s9  ;;  %s3055_s9 = sld [smem:[#allocation26_spill]] }
 0x1bf   : > { %540 = vrot.lane.b32.xlu1 %v446_v19, %s2418_s8  ;;  %1829 = vmatprep.mubr.msk.f32.mxu0 %vm2416_vm0, %v2417_v1 }
 0x1c4   : > { %s2930_s18 = scalar_lea.hbm %s3055_s9, %s1742_s16 }
 0x228   : > { %v2843_v24 = vpop.permute.xlu1 %2088  ;;  %v2845_v25 = vpop.permute.xlu0 %2078 }
 0x229   : > { %v2091_v26 = vunpack.i.h.bf16 %v2843_v24  ;;  %v2090_v27 = vunpack.i.l.bf16 %v2843_v24  ;;  %v2081_v28 = vunpack.i.h.bf16 %v2845_v25  ;;  %v2080_v29 = vunpack.i.l.bf16 %v2845_v25 }
 0x22b   : > { %v1906_v30 = vpack.c.bf16 %v2081_v28, %v2080_v29  ;;  %v1914_v35 = vpack.c.bf16 %v2091_v26, %v2090_v27 }
 0x22c   : > { %v2851_v31 = vpop.permute.xlu0 %2083  ;;  %v537_v36 = vpop.permute.xlu1 %536 }
 0x22d   : > { %v2086_v32 = vunpack.i.h.bf16 %v2851_v31  ;;  %v2085_v33 = vunpack.i.l.bf16 %v2851_v31  ;;  %1908 = vmatpush3.bf16.xpose.msk.msra.mxu1 %vm2830_vm3, %v1906_v30 }
 0x22e   : > { %1913 = vmatprep.subr.bf16.mxu1 %v2415_v0 }
 0x22f   : > { %v1910_v34 = vpack.c.bf16 %v2086_v32, %v2085_v33 }
 0x230   : > { %v539_v37 = vpop.permute.xlu0 %538 }
 0x231   : > { %1912 = vmatpush3.bf16.xpose.msk.msra.mxu0 %vm2830_vm3, %v1910_v34  ;;  %v541_v38 = vpop.permute.xlu1 %540 }
 0x232   : > { %1917 = vmatprep.subr.bf16.mxu0 %v2415_v0 }
 0x234   : > { %1823 = vmatmul.mubr.msk.f32.vlgmr.msra.gmra.mrb[2].mxu1 %vm564_vm2, %v537_v36 }
 0x235   : > { %1916 = vmatpush3.bf16.xpose.msk.msra.mxu1 %vm2830_vm3, %v1914_v35  ;;  %1836 = vmatprep.mubr.msk.f32.mxu1 %vm2416_vm0, %v2417_v1 }
 0x236   : > { %1920 = vmatprep.subr.bf16.mxu1 %v2415_v0 }
 0x238   : > { %1830 = vmatmul.mubr.msk.f32.vlgmr.msra.gmra.mrb[4].mxu0 %vm564_vm2, %v539_v37 }
 0x239   : > { %1843 = vmatprep.mubr.msk.f32.mxu0 %vm2416_vm0, %v2417_v1 }
 0x23c   : > { %1837 = vmatmul.mubr.msk.f32.vlgmr.msra.gmra.mrb[4].mxu1 %vm564_vm2, %v541_v38 }
 0x23d   : > { %1850 = vmatprep.mubr.msk.f32.mxu1 %vm2416_vm0, %v2417_v1 }
 0x291   : > { %v637_v46 = vpop.f32.mrb[2].mxu0 }
 0x292   : > { %v638_v47 = vadd.f32 %v637_v46, %v563_v45  ;;  %v1817_v48 = vpop.f32.mrb[3].mxu0 }
 0x294   : > { %v870_v49 = vsel %vm869_vm5, %v638_v47, -inf }
 0x295   : > { %871 = vmax.xlane.f32.xlu0 %v870_v49  ;;  %v1232_v49 = vld [vmem:[#allocation10 + $0x10] sm:$0xff] }
 0x307   : > { %v713_v50 = vpop.f32.mrb[2].mxu1 }
 0x308   : > { %v714_v51 = vadd.f32 %v713_v50, %v563_v45  ;;  %v1824_v52 = vpop.f32.mrb[3].mxu1 }
 0x30a   : > { %v873_v53 = vsel %vm869_vm5, %v714_v51, -inf }
 0x30b   : > { %874 = vmax.xlane.f32.xlu1 %v873_v53  ;;  %v789_v54 = vpop.f32.mrb[4].mxu0 }
 0x30c   : > { %v790_v55 = vadd.f32 %v789_v54, %v563_v45  ;;  %v1831_v56 = vpop.f32.mrb[5].mxu0  ;;  %v1233_v54 = vld [vmem:[#allocation10 + $0x18] sm:$0xff] }
 0x30e   : > { %v876_v57 = vsel %vm869_vm5, %v790_v55, -inf }
 0x30f   : > { %v865_v58 = vpop.f32.mrb[4].mxu1  ;;  %877 = vmax.xlane.f32.xlu0 %v876_v57 }
 0x310   : > { %v866_v59 = vadd.f32 %v865_v58, %v563_v45  ;;  %v1838_v60 = vpop.f32.mrb[5].mxu1 }
 0x312   : > { %v879_v61 = vsel %vm869_vm5, %v866_v59, -inf }
 0x313   : > { %880 = vmax.xlane.f32.xlu0 %v879_v61 }
 0x31c   : > { %2093 = vrot.lane.b32.xlu1 %v2826_v21, %s2422_s21 }
 0x322   : > { %v872_v62 = vpop.xlane.xlu0 %871 }
 0x323   : > { %v882_v63 = vsub.f32 %v638_v47, %v872_v62 }
 0x325   : > { %v886_v2 = vmul.f32 1.442695, %v882_v63 }
 0x327   : > { %2112 = vpow2.f32 %v886_v2 }
 0x331   : > { %v2113_v3 = vpop.eup %2112 }
 0x332   : > { %v894_v4 = vsel %vm869_vm5, %v2113_v3, 0.0 }
 0x340   : > { %895 = vadd.xlane.f32.xlu1 %v894_v4 }
 0x398   : > { %v875_v5 = vpop.xlane.xlu1 %874 }
 0x399   : > { %v883_v6 = vsub.f32 %v714_v51, %v875_v5 }
 0x39b   : > { %v888_v7 = vmul.f32 1.442695, %v883_v6 }
 0x39c   : > { %v2094_v8 = vpop.permute.xlu1 %2093  ;;  %v878_v9 = vpop.xlane.xlu0 %877 }
 0x39d   : > { %2114 = vpow2.f32 %v888_v7  ;;  %v2096_v10 = vunpack.i.h.bf16 %v2094_v8  ;;  %v2095_v11 = vunpack.i.l.bf16 %v2094_v8  ;;  %v884_v12 = vsub.f32 %v790_v55, %v878_v9  ;;  %v1739_v9 = vld [vmem:[%s3054_s19] ss:$0 sm:$0xff] }
 0x39f   : > { %v1918_v13 = vpack.c.bf16 %v2096_v10, %v2095_v11  ;;  %v890_v14 = vmul.f32 1.442695, %v884_v12 }
 0x3a0   : > { %v881_v15 = vpop.xlane.xlu0 %880 }
 0x3a1   : > { %2116 = vpow2.f32 %v890_v14  ;;  %v885_v16 = vsub.f32 %v866_v59, %v881_v15  ;;  %1919 = vmatpush3.bf16.msra.mxu0 %v1918_v13 }
 0x3a2   : > { %1923 = vmatprep.subr.bf16.mxu0 %v2415_v0 }
 0x3a3   : > { %v892_v17 = vmul.f32 1.442695, %v885_v16 }
 0x3a5   : > { %2118 = vpow2.f32 %v892_v17 }
 0x3a7   : > { %v2115_v18 = vpop.eup %2114 }
 0x3a8   : > { %v897_v19 = vsel %vm869_vm5, %v2115_v18, 0.0 }
 0x3a9   : > { %898 = vadd.xlane.f32.xlu0 %v897_v19 }
 0x3ab   : > { %v2117_v20 = vpop.eup %2116 }
 0x3ac   : > { %v900_v21 = vsel %vm869_vm5, %v2117_v20, 0.0 }
 0x3ad   : > { %901 = vadd.xlane.f32.xlu1 %v900_v21 }
 0x3af   : > { %v2119_v22 = vpop.eup %2118 }
 0x3b0   : > { %v903_v23 = vsel %vm869_vm5, %v2119_v22, 0.0 }
 0x3b1   : > { %904 = vadd.xlane.f32.xlu0 %v903_v23 }
 0x3be   : > { %2103 = vrot.lane.b32.xlu1 %v2851_v31, %s2422_s21 }
 0x3c2   : > { %2108 = vrot.lane.b32.xlu1 %v2843_v24, %s2422_s21 }
 0x3c7   : > { %2098 = vrot.lane.b32.xlu0 %v2845_v25, %s2422_s21  ;;  %s2272_s21 = scalar_lea.vmem %s2932_s6, 128 }
 0x3c8   : > { %p2273_p6 = scmp.ne.s32.totalorder %s2932_s6, %s2272_s21  ;;  %p2280_p2 = scmp.lt.s32.totalorder %s2278_s20, %s2272_s21 }
 0x3ca   : > { %p2274_p1 = pnand %p2273_p6, %p3056_p10  ;;  %p2281_p7 = por %p2280_p2, %p2279_p12 }
 0x3cc   : > { %p2275_p3 = pneg %p2274_p1 }
 0x3cd   : > { %v896_v26 = vpop.xlane.xlu1 %895 }
 0x3ce   : > { %2120 = vrcp.f32 %v896_v26  ;;  %p2282_p11 = pnand %p2281_p7, %p2275_p3 }
 0x3d8   : > { %v2121_v27 = vpop.eup %2120 }
 0x3d9   : > { %v910_v28 = vmul.f32 %v2121_v27, %v2113_v3 }
 0x3db   : > { %1844 = vmatmul.mubr.msk.f32.vlgmr.msra.gmra.mrb[6].mxu0 %vm869_vm5, %v910_v28 }
 0x3dc   : > { %1857 = vmatprep.mubr.msk.f32.mxu0 %vm2416_vm0, %v2417_v1 }
 0x436   : > { %v899_v29 = vpop.xlane.xlu0 %898 }
 0x437   : > { %2122 = vrcp.f32 %v899_v29 }
 0x43a   : > { %v902_v30 = vpop.xlane.xlu1 %901 }
 0x43b   : > { %2124 = vrcp.f32 %v902_v30 }
 0x43e   : > { %v2104_v31 = vpop.permute.xlu1 %2103  ;;  %v905_v32 = vpop.xlane.xlu0 %904 }
 0x43f   : > { %v2106_v33 = vunpack.i.h.bf16 %v2104_v31  ;;  %v2105_v24 = vunpack.i.l.bf16 %v2104_v31  ;;  %2126 = vrcp.f32 %v905_v32 }
 0x441   : > { %v1924_v34 = vpack.c.bf16 %v2106_v33, %v2105_v24  ;;  %v2123_v38 = vpop.eup %2122 }
 0x442   : > { %v2109_v25 = vpop.permute.xlu1 %2108  ;;  %v2099_v35 = vpop.permute.xlu0 %2098  ;;  %v911_v45 = vmul.f32 %v2123_v38, %v2115_v18 }
 0x443   : > { %v2101_v36 = vunpack.i.h.bf16 %v2099_v35  ;;  %v2100_v37 = vunpack.i.l.bf16 %v2099_v35  ;;  %1925 = vmatpush3.bf16.msra.mxu0 %v1924_v34  ;;  %v2111_v40 = vunpack.i.h.bf16 %v2109_v25  ;;  %v2110_v41 = vunpack.i.l.bf16 %v2109_v25 }
 0x444   : > { %1867 = vmatprep.subr.mxu0 %v2417_v1 }
 0x445   : > { %v2125_v39 = vpop.eup %2124  ;;  %v1921_v42 = vpack.c.bf16 %v2101_v36, %v2100_v37  ;;  %v1927_v47 = vpack.c.bf16 %v2111_v40, %v2110_v41 }
 0x446   : > { %v912_v43 = vmul.f32 %v2125_v39, %v2117_v20 }
 0x447   : > { %1922 = vmatpush3.bf16.msra.mxu1 %v1921_v42 }
 0x448   : > { %1858 = vmatmul.mubr.msk.f32.vlgmr.msra.gmra.mrb[8].mxu0 %vm869_vm5, %v912_v43  ;;  %1926 = vmatprep.subr.bf16.mxu1 %v2415_v0  ;;  %v1231_v0 = vld [vmem:[#allocation10 + $0x8] sm:$0xff] }
 0x449   : > { %v2127_v46 = vpop.eup %2126  ;;  %1868 = vmatpush3.msra.mxu0 %v1230_v44  ;;  %1869 = vmatprep.mubr.msk.f32.mxu0 %vm2416_vm0, %v2417_v1 }
 0x44a   : > { %1851 = vmatmul.mubr.msk.f32.vlgmr.msra.gmra.mrb[6].mxu1 %vm869_vm5, %v911_v45  ;;  %1877 = vmatprep.subr.mxu0 %v2417_v1  ;;  %v913_v48 = vmul.f32 %v2127_v46, %v2119_v22 }
 0x44b   : > { %1928 = vmatpush3.bf16.msra.mxu1 %v1927_v47  ;;  %1864 = vmatprep.mubr.msk.f32.mxu1 %vm2416_vm0, %v2417_v1 }
 0x44c   : > { %1872 = vmatprep.subr.mxu1 %v2417_v1 }
 0x44e   : > { %1865 = vmatmul.mubr.msk.f32.vlgmr.msra.gmra.mrb[8].mxu1 %vm869_vm5, %v913_v48 }
 0x44f   : > { %1874 = vmatprep.mubr.msk.f32.mxu1 %vm2416_vm0, %v2417_v1  ;;  %1873 = vmatpush3.msra.mxu1 %v1231_v0 }
 0x450   : > { %1882 = vmatprep.subr.mxu1 %v2417_v1 }
 0x4ae   : > { %v989_v50 = vpop.f32.mrb[6].mxu0 }
 0x4af   : > { %v1845_v51 = vpop.f32.mrb[7].mxu0  ;;  %1870 = vmatmul.mubr.msk.f32.vlgmr.msra.gmra.mrb[10].mxu0 %vm564_vm2, %v989_v50 }
 0x4b0   : > { %1878 = vmatpush3.msra.mxu0 %v1232_v49  ;;  %1879 = vmatprep.mubr.msk.f32.mxu0 %vm2416_vm0, %v2417_v1 }
 0x51b   : > { %v1147_v52 = vpop.f32.mrb[8].mxu0 }
 0x51c   : > { %v1859_v53 = vpop.f32.mrb[9].mxu0  ;;  %1880 = vmatmul.mubr.msk.f32.vlgmr.msra.gmra.mrb[12].mxu0 %vm564_vm2, %v1147_v52 }
 0x51d   : > { %v1068_v55 = vpop.f32.mrb[6].mxu1 }
 0x51e   : > { %v1852_v56 = vpop.f32.mrb[7].mxu1  ;;  %1875 = vmatmul.mubr.msk.f32.vlgmr.msra.gmra.mrb[10].mxu1 %vm564_vm2, %v1068_v55 }
 0x51f   : > { %1883 = vmatpush3.msra.mxu1 %v1233_v54  ;;  %1884 = vmatprep.mubr.msk.f32.mxu1 %vm2416_vm0, %v2417_v1 }
 0x521   : > { %v1226_v57 = vpop.f32.mrb[8].mxu1 }
 0x522   : > { %v1866_v58 = vpop.f32.mrb[9].mxu1  ;;  %1885 = vmatmul.mubr.msk.f32.vlgmr.msra.gmra.mrb[12].mxu1 %vm564_vm2, %v1226_v57 }
 0x582   : > { %v1303_v59 = vpop.f32.mrb[10].mxu0 }
 0x583   : > { %v1871_v60 = vpop.f32.mrb[11].mxu0  ;;  %v1526_v2 = vsel %vm376_vm1, %v1303_v59, 0.0 }
 0x5ef   : > { %v1449_v61 = vpop.f32.mrb[12].mxu0 }
 0x5f0   : > { %v1881_v62 = vpop.f32.mrb[13].mxu0  ;;  %v1529_v1 = vsel %vm376_vm1, %v1449_v61, 0.0 }
 0x5f1   : > { %v1376_v63 = vpop.f32.mrb[10].mxu1 }
 0x5f2   : > { %v1527_v3 = vsel %vm376_vm1, %v1376_v63, 0.0  ;;  %v1876_v4 = vpop.f32.mrb[11].mxu1 }
 0x5f3   : > { %v1528_v5 = vadd.f32 %v1527_v3, %v1526_v2 }
 0x5f5   : > { %v1522_v6 = vpop.f32.mrb[12].mxu1  ;;  %v1530_v7 = vadd.f32 %v1529_v1, %v1528_v5 }
 0x5f6   : > { %v1531_v8 = vsel %vm376_vm1, %v1522_v6, 0.0  ;;  %v1886_v10 = vpop.f32.mrb[13].mxu1 }
 0x5f7   : > { %v1532_v11 = vadd.f32 %v1531_v8, %v1530_v7 }
 0x5f9   : > { %v1540_v12 = vadd.f32 %v1739_v9, %v1532_v11 }
 0x5fb   : > { %v1541_v13 = vmax.f32 %v1540_v12, 0.0 }
 0x5fd   : > { %1542 = vst.msk [vmem:[%s367_s14] sm:$0xff] %vm376_vm1, %v1541_v13 }
 0x5fe   : > { %2285 = shalt.err (!%p2282_p11)
}
 0x5ff   : > { %s2286_s2 = scalar_lea.hbm %s2930_s18, 128  ;;  %s2290_s10 = scalar_lea.hbm %s3055_s9, 512 }
 0x600   : > { %p2287_p5 = scmp.ne.s32.totalorder %s2930_s18, %s2286_s2  ;;  %p2291_p9 = scmp.lt.u32.totalorder %s2930_s18, %s3055_s9 }
 0x601   : > { %p2292_p0 = scmp.lt.u32.totalorder %s2290_s10, %s2286_s2  ;;  %p2294_p6 = scmp.lt.u32.totalorder %s2286_s2, %s2930_s18 }
 0x602   : > { %p2288_p13 = pnand %p2287_p5, %p3056_p10 }
 0x603   : > { %p2293_p8 = por %p2292_p0, %p2291_p9 }
 0x604   : > { %p2289_p4 = pneg %p2288_p13 }
 0x605   : > { %p2295_p1 = por %p2294_p6, %p2293_p8 }
 0x607   : > { %p2296_p3 = pnand %p2295_p1, %p2289_p4 }
 0x609   : > { %2299 = shalt.err (!%p2296_p3)
}
 0x60a   : > { %1945 = dma.vmem_to_hbm [thread:$0]  (%p3056_p10), %s2932_s6, 128, %s2930_s18, %s1544_s27  }
 0x60b PF: > { %p1975_p12 = scmp.ge.s32.totalorder %s2406_s7, 2  ;;  %s1571_s14 = sand.u32 1, %s2378_s24  }
 0x60c   : > { %p3057_p2 = scmp.ne.s32.totalorder %s3035_s17, 0  ;;  %s1572_s8 = scalar_lea.sflag [#allocation4], %s1571_s14 }
 0x60e   : > { %p1965_p7 = pnand %p1975_p12, %p3057_p2 }
 0x610   : > { %2361 = dma.done.wait (!%p1965_p7), %s1572_s8, 128  }
 0x611   : > { %2363 = vsyncadd (!%p1965_p7), %s1572_s8, 4294967168  ;;  %s26_s7 = sadd.s32 1, %s2406_s7   ;;  %s3058_s12 = sld [smem:[#allocation20_spill]] }
 0x612   : > { %p23_p11 = scmp.ge.s32.totalorder %s26_s7, 6   ;;  %s3059_s21 = smov %s2370_s22 }
 0x613   : > { %s3060_s22 = smov %s2374_s23  ;;  %s3061_s23 = smov %s2673_s15 }
 0x614   : > { %s3062_s24 = smov %s2382_s25  ;;  %s3063_s25 = smov %s2386_s26 }
 0x615   : > { %s3064_s26 = smov %s2676_s5  ;;  %s3065_s27 = smov %s2398_s29 }
 0x616   : > { %s3066_s28 = smov %s2402_s30  ;;  %s3067_s29 = smov %s3070_s13 }
 0x617   : > { %s3068_s30 = smov %s3058_s12  ;;  %25 = sbr.rel (!%p23_p11) target bundleno = 19 (0x13), region = 114 }
 0x61e   :  { %1577 = vsyncpa [#allocation3], 1 }
 0x61f   :  { %1579 = vsyncpa [#allocation3 + $0x1], 1 }
 0x620   :  { %1580 = vsyncpa [#allocation6], 1 }
 0x621   :  { %1582 = vsyncpa [#allocation6 + $0x1], 1 }
 0x622   :  { %1583 = vsyncpa [#allocation9], 1 }
 0x623   :  { %1584 = vsyncpa [#allocation4], 1 }
 0x624   :  { %1586 = vsyncpa [#allocation4 + $0x1], 1 }

</bundles_post_ra>
